<compile_context>
chip_gen: v5e
topology: v5e:2x2
jax: 0.10.0
libtpu: 0.0.40
codegen_flags: <defaults>
</compile_context>

<pallas_src>
import jax
import jax.numpy as jnp
from jax.experimental import pallas as pl
from jax.experimental.pallas import tpu as pltpu


def ffn_kernel(x_ref, w1_ref, b1_ref, w2_ref, b2_ref, o_ref):
    # Hot path: two bf16 MXU matmuls with f32 accumulation, fused bias/ReLU
    # epilogue, one store stream.
    x = x_ref[...].astype(w1_ref.dtype)                       # f32 -> bf16 on VPU
    h = jnp.dot(x, w1_ref[...], preferred_element_type=jnp.float32)
    h = jnp.maximum(h + b1_ref[...], 0.0)                     # bias + ReLU in f32
    y = jnp.dot(h.astype(w2_ref.dtype), w2_ref[...],
                preferred_element_type=jnp.float32)
    o_ref[...] = (y + b2_ref[...]).astype(o_ref.dtype)


def _round_up(v, m):
    return (v + m - 1) // m * m


def feed_forward_net(x, w1, b1, w2, b2, *, tm=512, compute_dtype=jnp.bfloat16):
    """Eval-mode FFN: relu(x @ w1 + b1) @ w2 + b2  (dropout = identity).

    x      : (M, H) activations (output keeps this dtype)
    w1, w2 : (H, H) weights laid out (in, out)  (transposed vs nn.Linear)
    b1, b2 : (H,)   biases
    """
    M, H = x.shape
    out_dtype = x.dtype

    # Lane-dense feature axis (multiple of 128) -> unmasked stores, full MXU cols.
    Hp = _round_up(H, 128)
    # M tile: default 512 (multiple of 256/128); shrink to a sublane multiple
    # for tiny inputs so the demo shapes still tile legally.
    tm_eff = tm if M > tm else _round_up(M, 8)
    Mp = _round_up(M, tm_eff)

    # Zero-padding is exact: padded x columns hit zero W1 rows, padded hidden
    # columns are relu(0+0)=0 and hit zero W2 rows, padded rows/cols are sliced.
    if (Mp, Hp) != (M, H):
        xp = jnp.zeros((Mp, Hp), x.dtype).at[:M, :H].set(x)
    else:
        xp = x

    def pad_w(w):
        w = w.astype(compute_dtype)
        if Hp != H:
            w = jnp.zeros((Hp, Hp), compute_dtype).at[:H, :H].set(w)
        return w

    def pad_b(b):
        b = b.astype(jnp.float32)
        if Hp != H:
            b = jnp.zeros((Hp,), jnp.float32).at[:H].set(b)
        return b.reshape(1, Hp)

    w1p, w2p = pad_w(w1), pad_w(w2)
    b1p, b2p = pad_b(b1), pad_b(b2)

    grid = (Mp // tm_eff,)
    out_shape = jax.ShapeDtypeStruct((Mp, Hp), out_dtype)
    cb = jnp.dtype(compute_dtype).itemsize

    def build(single_buffer_resident):
        # Explicit VMEM budget: resident weights/biases, double-buffered
        # x / out tiles, f32 intermediates, plus slack.
        w_copies = 1 if single_buffer_resident else 2
        vmem_needed = (
            w_copies * 2 * Hp * Hp * cb                         # W1, W2
            + w_copies * 2 * Hp * 4                             # b1, b2
            + 2 * tm_eff * Hp * xp.dtype.itemsize               # x  (double buf)
            + 2 * tm_eff * Hp * jnp.dtype(out_dtype).itemsize   # out (double buf)
            + 4 * tm_eff * Hp * 4                               # f32 intermediates
        )
        vmem_limit = int(min(vmem_needed + (8 << 20), 112 << 20))

        if single_buffer_resident:
            # Constant index_map -> resident; Buffered(1) drops the useless
            # second VMEM copy of each weight/bias.
            def res(shape):
                return pl.BlockSpec(shape, lambda i: (0, 0),
                                    pipeline_mode=pl.Buffered(1))
        else:
            def res(shape):
                return pl.BlockSpec(shape, lambda i: (0, 0))

        return pl.pallas_call(
            ffn_kernel,
            out_shape=out_shape,
            grid_spec=pltpu.PrefetchScalarGridSpec(
                num_scalar_prefetch=0,
                grid=grid,
                in_specs=[
                    pl.BlockSpec((tm_eff, Hp), lambda i: (i, 0)),  # x tile
                    res((Hp, Hp)),                                 # W1 (resident)
                    res((1, Hp)),                                  # b1
                    res((Hp, Hp)),                                 # W2 (resident)
                    res((1, Hp)),                                  # b2
                ],
                out_specs=pl.BlockSpec((tm_eff, Hp), lambda i: (i, 0)),
            ),
            compiler_params=pltpu.CompilerParams(
                dimension_semantics=("parallel",),   # megacore-shard M on v7x
                vmem_limit_bytes=vmem_limit,
            ),
        )

    try:
        out = build(True)(xp, w1p, b1p, w2p, b2p)
    except Exception:
        # Guard: some jax versions reject pipeline_mode on pallas_call specs;
        # fall back to default (double-buffered) resident weights.
        out = build(False)(xp, w1p, b1p, w2p, b2p)

    return out[:M, :H]


if __name__ == "__main__":
    # Small, lane-dense demo shapes: batch=2, seq=8, hidden=128.
    B, S, H = 2, 8, 128
    key = jax.random.PRNGKey(0)
    kx, kw1, kb1, kw2, kb2 = jax.random.split(key, 5)

    x = jax.random.normal(kx, (B, S, H), dtype=jnp.float32)

    # nn.Linear(H, H): weight (out, in), bias (out,), U(-1/sqrt(H), 1/sqrt(H)).
    bound = 1.0 / (H ** 0.5)
    w1_oi = jax.random.uniform(kw1, (H, H), minval=-bound, maxval=bound,
                               dtype=jnp.float32)
    b1 = jax.random.uniform(kb1, (H,), minval=-bound, maxval=bound,
                            dtype=jnp.float32)
    w2_oi = jax.random.uniform(kw2, (H, H), minval=-bound, maxval=bound,
                               dtype=jnp.float32)
    b2 = jax.random.uniform(kb2, (H,), minval=-bound, maxval=bound,
                            dtype=jnp.float32)

    # Pre-transpose nn.Linear weights to (in, out) for the kernel.
    w1 = w1_oi.T
    w2 = w2_oi.T

    x2d = x.reshape(B * S, H)
    out2d = feed_forward_net(x2d, w1, b1, w2, b2)
    out = out2d.reshape(B, S, H)
    jax.block_until_ready(out)

    # Reference (pure f32 JAX; eval-mode dropout = identity).  Kernel matmuls
    # are bf16-with-f32-accumulation, so compare at bf16-level tolerance.
    ref = jnp.maximum(x2d @ w1 + b1, 0.0) @ w2 + b2
    max_err = float(jnp.max(jnp.abs(out2d - ref)))
    assert jnp.allclose(out2d, ref, atol=3e-2, rtol=3e-2), max_err

    print("KERNEL_OK")
</pallas_src>

<mosaic_0001>
module attributes {stable_mosaic.version = 11 : i64} {
  func.func @ffn_kernel(%arg0: i32, %arg1: memref<16x128xf32, #tpu.memory_space<vmem>>, %arg2: memref<128x128xbf16, #tpu.memory_space<vmem>>, %arg3: memref<1x128xf32, #tpu.memory_space<vmem>>, %arg4: memref<128x128xbf16, #tpu.memory_space<vmem>>, %arg5: memref<1x128xf32, #tpu.memory_space<vmem>>, %arg6: memref<16x128xf32, #tpu.memory_space<vmem>>) attributes {dimension_semantics = [#tpu.dimension_semantics<parallel>], iteration_bounds = array<i64: 1>, scalar_prefetch = 0 : i64, scratch_operands = 0 : i64, tpu.core_type = #tpu.core_type<tc>, window_params = [{transform_indices = @transform_0, window_bounds = array<i64: 16, 128>}, {pipeline_mode = #tpu.pipeline_mode<synchronous>, transform_indices = @transform_1, window_bounds = array<i64: 128, 128>}, {pipeline_mode = #tpu.pipeline_mode<synchronous>, transform_indices = @transform_2, window_bounds = array<i64: 1, 128>}, {pipeline_mode = #tpu.pipeline_mode<synchronous>, transform_indices = @transform_3, window_bounds = array<i64: 128, 128>}, {pipeline_mode = #tpu.pipeline_mode<synchronous>, transform_indices = @transform_4, window_bounds = array<i64: 1, 128>}, {transform_indices = @transform_5, window_bounds = array<i64: 16, 128>}]} {
    %c0 = arith.constant 0 : index
    %c0_0 = arith.constant 0 : index
    %0 = vector.load %arg1[%c0, %c0_0] : memref<16x128xf32, #tpu.memory_space<vmem>>, vector<16x128xf32>
    %1 = arith.truncf %0 : vector<16x128xf32> to vector<16x128xbf16>
    %c0_1 = arith.constant 0 : index
    %c0_2 = arith.constant 0 : index
    %2 = vector.load %arg2[%c0_1, %c0_2] : memref<128x128xbf16, #tpu.memory_space<vmem>>, vector<128x128xbf16>
    %cst = arith.constant dense<0.000000e+00> : vector<16x128xf32>
    %3 = tpu.matmul %1, %2, %cst {dimension_numbers = #tpu.dot_dimension_numbers<[1], [0], [0], [1], [0, 0, 1, 1], [], []>} : vector<16x128xbf16>, vector<128x128xbf16>, vector<16x128xf32> -> vector<16x128xf32>
    %c0_3 = arith.constant 0 : index
    %c0_4 = arith.constant 0 : index
    %4 = vector.load %arg3[%c0_3, %c0_4] : memref<1x128xf32, #tpu.memory_space<vmem>>, vector<1x128xf32>
    %5 = vector.broadcast %4 : vector<1x128xf32> to vector<16x128xf32>
    %6 = arith.addf %3, %5 : vector<16x128xf32>
    %cst_5 = arith.constant 0.000000e+00 : f32
    %7 = vector.broadcast %cst_5 : f32 to vector<16x128xf32>
    %8 = arith.maximumf %6, %7 : vector<16x128xf32>
    %9 = arith.truncf %8 : vector<16x128xf32> to vector<16x128xbf16>
    %c0_6 = arith.constant 0 : index
    %c0_7 = arith.constant 0 : index
    %10 = vector.load %arg4[%c0_6, %c0_7] : memref<128x128xbf16, #tpu.memory_space<vmem>>, vector<128x128xbf16>
    %cst_8 = arith.constant dense<0.000000e+00> : vector<16x128xf32>
    %11 = tpu.matmul %9, %10, %cst_8 {dimension_numbers = #tpu.dot_dimension_numbers<[1], [0], [0], [1], [0, 0, 1, 1], [], []>} : vector<16x128xbf16>, vector<128x128xbf16>, vector<16x128xf32> -> vector<16x128xf32>
    %c0_9 = arith.constant 0 : index
    %c0_10 = arith.constant 0 : index
    %12 = vector.load %arg5[%c0_9, %c0_10] : memref<1x128xf32, #tpu.memory_space<vmem>>, vector<1x128xf32>
    %13 = vector.broadcast %12 : vector<1x128xf32> to vector<16x128xf32>
    %14 = arith.addf %11, %13 : vector<16x128xf32>
    %c0_11 = arith.constant 0 : index
    %c0_12 = arith.constant 0 : index
    %15 = vector.load %arg6[%c0_11, %c0_12] : memref<16x128xf32, #tpu.memory_space<vmem>>, vector<16x128xf32>
    tpu.vector_store %arg6[%c0_11, %c0_12], %14 {strides = array<i32>} : memref<16x128xf32, #tpu.memory_space<vmem>>, vector<16x128xf32>,
    return
  }
  func.func @transform_0(%arg0: i32) -> (i32, i32) {
    %c0_i32 = arith.constant 0 : i32
    %c0_i32_0 = arith.constant 0 : i32
    return %arg0, %c0_i32 : i32, i32
  }
  func.func @transform_1(%arg0: i32) -> (i32, i32) {
    %c0_i32 = arith.constant 0 : i32
    %c0_i32_0 = arith.constant 0 : i32
    %c0_i32_1 = arith.constant 0 : i32
    return %c0_i32, %c0_i32_0 : i32, i32
  }
  func.func @transform_2(%arg0: i32) -> (i32, i32) {
    %c0_i32 = arith.constant 0 : i32
    %c0_i32_0 = arith.constant 0 : i32
    %c0_i32_1 = arith.constant 0 : i32
    return %c0_i32, %c0_i32_0 : i32, i32
  }
  func.func @transform_3(%arg0: i32) -> (i32, i32) {
    %c0_i32 = arith.constant 0 : i32
    %c0_i32_0 = arith.constant 0 : i32
    %c0_i32_1 = arith.constant 0 : i32
    return %c0_i32, %c0_i32_0 : i32, i32
  }
  func.func @transform_4(%arg0: i32) -> (i32, i32) {
    %c0_i32 = arith.constant 0 : i32
    %c0_i32_0 = arith.constant 0 : i32
    %c0_i32_1 = arith.constant 0 : i32
    return %c0_i32, %c0_i32_0 : i32, i32
  }
  func.func @transform_5(%arg0: i32) -> (i32, i32) {
    %c0_i32 = arith.constant 0 : i32
    %c0_i32_0 = arith.constant 0 : i32
    return %arg0, %c0_i32 : i32, i32
  }
}

module attributes {stable_mosaic.version = 11 : i64} {
  func.func @ffn_kernel(%arg0: i32, %arg1: memref<16x128xf32, #tpu.memory_space<vmem>>, %arg2: memref<128x128xbf16, #tpu.memory_space<vmem>>, %arg3: memref<1x128xf32, #tpu.memory_space<vmem>>, %arg4: memref<128x128xbf16, #tpu.memory_space<vmem>>, %arg5: memref<1x128xf32, #tpu.memory_space<vmem>>, %arg6: memref<16x128xf32, #tpu.memory_space<vmem>>) attributes {dimension_semantics = [#tpu.dimension_semantics<parallel>], iteration_bounds = array<i64: 1>, scalar_prefetch = 0 : i64, scratch_operands = 0 : i64, tpu.core_type = #tpu.core_type<tc>, window_params = [{transform_indices = @transform_0, window_bounds = array<i64: 16, 128>}, {pipeline_mode = #tpu.pipeline_mode<synchronous>, transform_indices = @transform_1, window_bounds = array<i64: 128, 128>}, {pipeline_mode = #tpu.pipeline_mode<synchronous>, transform_indices = @transform_2, window_bounds = array<i64: 1, 128>}, {pipeline_mode = #tpu.pipeline_mode<synchronous>, transform_indices = @transform_3, window_bounds = array<i64: 128, 128>}, {pipeline_mode = #tpu.pipeline_mode<synchronous>, transform_indices = @transform_4, window_bounds = array<i64: 1, 128>}, {transform_indices = @transform_5, window_bounds = array<i64: 16, 128>}]} {
    %c0 = arith.constant 0 : index
    %c0_0 = arith.constant 0 : index
    %0 = vector.load %arg1[%c0, %c0_0] : memref<16x128xf32, #tpu.memory_space<vmem>>, vector<16x128xf32>
    %1 = arith.truncf %0 : vector<16x128xf32> to vector<16x128xbf16>
    %c0_1 = arith.constant 0 : index
    %c0_2 = arith.constant 0 : index
    %2 = vector.load %arg2[%c0_1, %c0_2] : memref<128x128xbf16, #tpu.memory_space<vmem>>, vector<128x128xbf16>
    %cst = arith.constant dense<0.000000e+00> : vector<16x128xf32>
    %3 = tpu.matmul %1, %2, %cst {dimension_numbers = #tpu.dot_dimension_numbers<[1], [0], [0], [1], [0, 0, 1, 1], [], []>} : vector<16x128xbf16>, vector<128x128xbf16>, vector<16x128xf32> -> vector<16x128xf32>
    %c0_3 = arith.constant 0 : index
    %c0_4 = arith.constant 0 : index
    %4 = vector.load %arg3[%c0_3, %c0_4] : memref<1x128xf32, #tpu.memory_space<vmem>>, vector<1x128xf32>
    %5 = vector.broadcast %4 : vector<1x128xf32> to vector<16x128xf32>
    %6 = arith.addf %3, %5 : vector<16x128xf32>
    %cst_5 = arith.constant 0.000000e+00 : f32
    %7 = vector.broadcast %cst_5 : f32 to vector<16x128xf32>
    %8 = arith.maximumf %6, %7 : vector<16x128xf32>
    %9 = arith.truncf %8 : vector<16x128xf32> to vector<16x128xbf16>
    %c0_6 = arith.constant 0 : index
    %c0_7 = arith.constant 0 : index
    %10 = vector.load %arg4[%c0_6, %c0_7] : memref<128x128xbf16, #tpu.memory_space<vmem>>, vector<128x128xbf16>
    %cst_8 = arith.constant dense<0.000000e+00> : vector<16x128xf32>
    %11 = tpu.matmul %9, %10, %cst_8 {dimension_numbers = #tpu.dot_dimension_numbers<[1], [0], [0], [1], [0, 0, 1, 1], [], []>} : vector<16x128xbf16>, vector<128x128xbf16>, vector<16x128xf32> -> vector<16x128xf32>
    %c0_9 = arith.constant 0 : index
    %c0_10 = arith.constant 0 : index
    %12 = vector.load %arg5[%c0_9, %c0_10] : memref<1x128xf32, #tpu.memory_space<vmem>>, vector<1x128xf32>
    %13 = vector.broadcast %12 : vector<1x128xf32> to vector<16x128xf32>
    %14 = arith.addf %11, %13 : vector<16x128xf32>
    %c0_11 = arith.constant 0 : index
    %c0_12 = arith.constant 0 : index
    %15 = vector.load %arg6[%c0_11, %c0_12] : memref<16x128xf32, #tpu.memory_space<vmem>>, vector<16x128xf32>
    tpu.vector_store %arg6[%c0_11, %c0_12], %14 {strides = array<i32>} : memref<16x128xf32, #tpu.memory_space<vmem>>, vector<16x128xf32>,
    return
  }
  func.func @transform_0(%arg0: i32) -> (i32, i32) {
    %c0_i32 = arith.constant 0 : i32
    %c0_i32_0 = arith.constant 0 : i32
    return %arg0, %c0_i32 : i32, i32
  }
  func.func @transform_1(%arg0: i32) -> (i32, i32) {
    %c0_i32 = arith.constant 0 : i32
    %c0_i32_0 = arith.constant 0 : i32
    %c0_i32_1 = arith.constant 0 : i32
    return %c0_i32, %c0_i32_0 : i32, i32
  }
  func.func @transform_2(%arg0: i32) -> (i32, i32) {
    %c0_i32 = arith.constant 0 : i32
    %c0_i32_0 = arith.constant 0 : i32
    %c0_i32_1 = arith.constant 0 : i32
    return %c0_i32, %c0_i32_0 : i32, i32
  }
  func.func @transform_3(%arg0: i32) -> (i32, i32) {
    %c0_i32 = arith.constant 0 : i32
    %c0_i32_0 = arith.constant 0 : i32
    %c0_i32_1 = arith.constant 0 : i32
    return %c0_i32, %c0_i32_0 : i32, i32
  }
  func.func @transform_4(%arg0: i32) -> (i32, i32) {
    %c0_i32 = arith.constant 0 : i32
    %c0_i32_0 = arith.constant 0 : i32
    %c0_i32_1 = arith.constant 0 : i32
    return %c0_i32, %c0_i32_0 : i32, i32
  }
  func.func @transform_5(%arg0: i32) -> (i32, i32) {
    %c0_i32 = arith.constant 0 : i32
    %c0_i32_0 = arith.constant 0 : i32
    return %arg0, %c0_i32 : i32, i32
  }
}

</mosaic_0001>

<bundles_post_ra>
// kernel: tpu_custom_call.1
= control target key start
LH: loop header
LB: loop body
LE: loop exit
PB: predicated region body
PF: predicated region fallthrough
CT: control target
= control target key end

     0   :  { %10 = vsyncpa [#allocation3], 0  ;;  %s514_s0 = inlined_call_operand.hbm [shape: f32[16,128], index: 0, kind: input, shape index: {}]   ;;  %s515_s1 = inlined_call_operand.hbm [shape: bf16[128,128], index: 1, kind: input, shape index: {}]   ;;  %s516_s2 = inlined_call_operand.vmem [shape: f32[1,128], index: 2, kind: input, shape index: {}]   ;;  %s517_s3 = inlined_call_operand.hbm [shape: bf16[128,128], index: 3, kind: input, shape index: {}]   ;;  %s518_s4 = inlined_call_operand.vmem [shape: f32[1,128], index: 4, kind: input, shape index: {}]   ;;  %s519_s5 = inlined_call_operand.hbm [shape: f32[16,128], index: 5, kind: output, shape index: {}]  }
   0x1   :  { %11 = vsyncpa [#allocation6], 0  ;;  %s30_s20 = sshll.u32 %s515_s1, 4  ;;  %s31_s20 = int_to_ptr.hbm [resolvable:$true] %s30_s20 }
   0x2   :  { %12 = vsyncpa [#allocation4], 0  ;;  %s452_s21 = smov [#allocation5]   ;;  %s17_s25 = sshll.u32 %s514_s0, 4  ;;  %s18_s25 = int_to_ptr.hbm [resolvable:$true] %s17_s25 }
   0x3   :  { %s32_s22 = sshll.u32 %s452_s21, 4  ;;  %s453_s26 = smov 64   ;;  %s33_s22 = int_to_ptr.vmem [resolvable:$true] %s32_s22 }
   0x4   :  { %s454_s27 = smov 4   ;;  %s455_s28 = smov [#allocation2]  }
   0x5   :  { %38 = dma.hbm_to_vmem [thread:$0]  %s31_s20, 1024, %s33_s22, [#allocation6], %s453_s26, %s453_s26, %s454_s27  }
   0x6   :  { %s19_s29 = sshll.u32 %s455_s28, 4  ;;  %s456_s30 = smov 128   ;;  %s20_s29 = int_to_ptr.vmem [resolvable:$true] %s19_s29 }
   0x7   :  { %s457_s6 = smov 8   ;;  %s45_s8 = sshll.u32 %s517_s3, 4  ;;  %s46_s8 = int_to_ptr.hbm [resolvable:$true] %s45_s8 }
   0x8   :  { %25 = dma.hbm_to_vmem [thread:$0]  %s18_s25, 256, %s20_s29, [#allocation3], %s456_s30, %s456_s30, %s457_s6  }
   0x9   :  { %s458_s9 = smov [#allocation7]  }
   0xa   :  { %s47_s0 = sshll.u32 %s458_s9, 4  ;;  %s48_s0 = int_to_ptr.vmem [resolvable:$true] %s47_s0 }
   0xb   :  { %53 = dma.hbm_to_vmem [thread:$0]  %s46_s8, 1024, %s48_s0, [#allocation6], %s453_s26, %s453_s26, %s454_s27  }
   0xc   :  { %446 = dma.done.wait [#allocation3], 256  }
   0xd   :  { %447 = vsyncadd [#allocation3], 4294967040 }
   0xe   :  { %448 = dma.done.wait [#allocation6], 2048  }
   0xf   :  { %449 = vsyncadd [#allocation6], 4294965248  ;;  %v331_v0 = vld [vmem:[#allocation5 + $0x38] sm:$0xff]  ;;  %v330_v1 = vld [vmem:[#allocation5 + $0x30] sm:$0xff]  ;;  %s459_s13 = smov [#allocation8]  }
  0x10   :  { %139 = vmatpush.bf16.msra.mxu0 %v331_v0  ;;  %v339_v2 = vld [vmem:[#allocation7 + $0x38] sm:$0xff]  ;;  %v338_v3 = vld [vmem:[#allocation7 + $0x30] sm:$0xff]  ;;  %v329_v4 = vld [vmem:[#allocation5 + $0x28] sm:$0xff]  ;;  %s244_s14 = sshll.u32 %s459_s13, 4  ;;  %s245_s14 = int_to_ptr.vmem [resolvable:$true] %s244_s14 }
  0x11   :  { %224 = vmatpush.bf16.msra.mxu1 %v339_v2  ;;  %v337_v5 = vld [vmem:[#allocation7 + $0x28] sm:$0xff]  ;;  %v328_v6 = vld [vmem:[#allocation5 + $0x20] sm:$0xff]  ;;  %v327_v8 = vld [vmem:[#allocation5 + $0x18] sm:$0xff] }
  0x12   :  { %v336_v7 = vld [vmem:[#allocation7 + $0x20] sm:$0xff]  ;;  %v326_v9 = vld [vmem:[#allocation5 + $0x10] sm:$0xff]  ;;  %v325_v10 = vld [vmem:[#allocation5 + $0x8] sm:$0xff] }
  0x13   :  { %v324_v11 = vld [vmem:[#allocation5] sm:$0xff]  ;;  %v68_v12 = vld [vmem:[#allocation2] sm:$0xff]  ;;  %v69_v13 = vld [vmem:[#allocation2 + $0x8] sm:$0xff] }
  0x14   :  { %140 = vmatpush.bf16.msra.mxu0 %v330_v1  ;;  %v70_v14 = vpack.c.bf16 %v69_v13, %v68_v12  ;;  %v335_v15 = vld [vmem:[#allocation7 + $0x18] sm:$0xff]  ;;  %v334_v16 = vld [vmem:[#allocation7 + $0x10] sm:$0xff]  ;;  %v333_v17 = vld [vmem:[#allocation7 + $0x8] sm:$0xff] }
  0x15   :  { %225 = vmatpush.bf16.msra.mxu1 %v338_v3  ;;  %v332_v18 = vld [vmem:[#allocation7] sm:$0xff]  ;;  %v348_v20 = vld [vmem:[%s516_s2] ss:$0 sm:$0xff]  ;;  %s246_s2 = sshll.u32 %s519_s5, 4  ;;  %s247_s2 = int_to_ptr.hbm [resolvable:$true] %s246_s2 }
  0x16   :  { %v349_v27 = vld [vmem:[%s518_s4] ss:$0 sm:$0xff] }
  0x18   :  { %141 = vmatpush.bf16.msra.mxu0 %v329_v4 }
  0x19   :  { %226 = vmatpush.bf16.msra.mxu1 %v337_v5 }
  0x1c   :  { %142 = vmatpush.bf16.msra.mxu0 %v328_v6 }
  0x1d   :  { %227 = vmatpush.bf16.msra.mxu1 %v336_v7 }
  0x20   :  { %143 = vmatpush.bf16.msra.mxu0 %v327_v8 }
  0x21   :  { %228 = vmatpush.bf16.msra.mxu1 %v335_v15 }
  0x24   :  { %144 = vmatpush.bf16.msra.mxu0 %v326_v9 }
  0x25   :  { %229 = vmatpush.bf16.msra.mxu1 %v334_v16 }
  0x28   :  { %145 = vmatpush.bf16.msra.mxu0 %v325_v10 }
  0x29   :  { %230 = vmatpush.bf16.msra.mxu1 %v333_v17 }
  0x2c   :  { %146 = vmatpush.bf16.msra.mxu0 %v324_v11 }
  0x2d   :  { %231 = vmatpush.bf16.msra.mxu1 %v332_v18 }
  0x2f   :  { %147 = vmatmul.bf16.vlgmr.msra.gmra.mxu0 %v70_v14 }
  0xac   :  { %v148_v19 = vpop.f32.mrf.mxu0 }
  0xad   :  { %v149_v21 = vadd.f32 %v348_v20, %v148_v19 }
  0xaf   :  { %v153_v24 = vmax.f32 %v149_v21, 0.0 }
  0xb4   :  { %v150_v22 = vpop.f32.mrf.mxu0 }
  0xb5   :  { %v151_v23 = vadd.f32 %v348_v20, %v150_v22 }
  0xb7   :  { %v154_v25 = vmax.f32 %v151_v23, 0.0 }
  0xb9   :  { %v155_v26 = vpack.c.bf16 %v154_v25, %v153_v24 }
  0xbb   :  { %232 = vmatmul.bf16.vlgmr.msra.gmra.mxu1 %v155_v26 }
 0x138   :  { %v233_v28 = vpop.f32.mrf.mxu1 }
 0x139   :  { %v234_v29 = vadd.f32 %v349_v27, %v233_v28 }
 0x13b   :  { %238 = vst [vmem:[#allocation8] sm:$0xff] %v234_v29 }
 0x140   :  { %v235_v30 = vpop.f32.mrf.mxu1 }
 0x141   :  { %v236_v31 = vadd.f32 %v349_v27, %v235_v30 }
 0x143   :  { %239 = vst [vmem:[#allocation8 + $0x8] sm:$0xff] %v236_v31 }
 0x144   :  { %252 = dma.vmem_to_hbm [thread:$0]  %s245_s14, 256, %s247_s2, [#allocation4], %s456_s30, %s456_s30, %s457_s6  }
 0x145   :  { %450 = dma.done.wait [#allocation4], 256  }
 0x146   :  { %451 = vsyncadd [#allocation4], 4294967040 }
 0x147   :  { %257 = vsyncpa [#allocation3], 1 }
 0x148   :  { %258 = vsyncpa [#allocation6], 1 }
 0x149   :  { %259 = vsyncpa [#allocation4], 1 }

// kernel: tpu_custom_call.1
= control target key start
LH: loop header
LB: loop body
LE: loop exit
PB: predicated region body
PF: predicated region fallthrough
CT: control target
= control target key end

     0   :  { %10 = vsyncpa [#allocation3], 0  ;;  %s514_s0 = inlined_call_operand.hbm [shape: f32[16,128], index: 0, kind: input, shape index: {}]   ;;  %s515_s1 = inlined_call_operand.hbm [shape: bf16[128,128], index: 1, kind: input, shape index: {}]   ;;  %s516_s2 = inlined_call_operand.vmem [shape: f32[1,128], index: 2, kind: input, shape index: {}]   ;;  %s517_s3 = inlined_call_operand.hbm [shape: bf16[128,128], index: 3, kind: input, shape index: {}]   ;;  %s518_s4 = inlined_call_operand.vmem [shape: f32[1,128], index: 4, kind: input, shape index: {}]   ;;  %s519_s5 = inlined_call_operand.hbm [shape: f32[16,128], index: 5, kind: output, shape index: {}]  }
   0x1   :  { %11 = vsyncpa [#allocation6], 0  ;;  %s30_s20 = sshll.u32 %s515_s1, 4  ;;  %s31_s20 = int_to_ptr.hbm [resolvable:$true] %s30_s20 }
   0x2   :  { %12 = vsyncpa [#allocation4], 0  ;;  %s452_s21 = smov [#allocation5]   ;;  %s17_s25 = sshll.u32 %s514_s0, 4  ;;  %s18_s25 = int_to_ptr.hbm [resolvable:$true] %s17_s25 }
   0x3   :  { %s32_s22 = sshll.u32 %s452_s21, 4  ;;  %s453_s26 = smov 64   ;;  %s33_s22 = int_to_ptr.vmem [resolvable:$true] %s32_s22 }
   0x4   :  { %s454_s27 = smov 4   ;;  %s455_s28 = smov [#allocation2]  }
   0x5   :  { %38 = dma.hbm_to_vmem [thread:$0]  %s31_s20, 1024, %s33_s22, [#allocation6], %s453_s26, %s453_s26, %s454_s27  }
   0x6   :  { %s19_s29 = sshll.u32 %s455_s28, 4  ;;  %s456_s30 = smov 128   ;;  %s20_s29 = int_to_ptr.vmem [resolvable:$true] %s19_s29 }
   0x7   :  { %s457_s6 = smov 8   ;;  %s45_s8 = sshll.u32 %s517_s3, 4  ;;  %s46_s8 = int_to_ptr.hbm [resolvable:$true] %s45_s8 }
   0x8   :  { %25 = dma.hbm_to_vmem [thread:$0]  %s18_s25, 256, %s20_s29, [#allocation3], %s456_s30, %s456_s30, %s457_s6  }
   0x9   :  { %s458_s9 = smov [#allocation7]  }
   0xa   :  { %s47_s0 = sshll.u32 %s458_s9, 4  ;;  %s48_s0 = int_to_ptr.vmem [resolvable:$true] %s47_s0 }
   0xb   :  { %53 = dma.hbm_to_vmem [thread:$0]  %s46_s8, 1024, %s48_s0, [#allocation6], %s453_s26, %s453_s26, %s454_s27  }
   0xc   :  { %446 = dma.done.wait [#allocation3], 256  }
   0xd   :  { %447 = vsyncadd [#allocation3], 4294967040 }
   0xe   :  { %448 = dma.done.wait [#allocation6], 2048  }
   0xf   :  { %449 = vsyncadd [#allocation6], 4294965248  ;;  %v331_v0 = vld [vmem:[#allocation5 + $0x38] sm:$0xff]  ;;  %v330_v1 = vld [vmem:[#allocation5 + $0x30] sm:$0xff]  ;;  %s459_s13 = smov [#allocation8]  }
  0x10   :  { %139 = vmatpush.bf16.msra.mxu0 %v331_v0  ;;  %v339_v2 = vld [vmem:[#allocation7 + $0x38] sm:$0xff]  ;;  %v338_v3 = vld [vmem:[#allocation7 + $0x30] sm:$0xff]  ;;  %v329_v4 = vld [vmem:[#allocation5 + $0x28] sm:$0xff]  ;;  %s244_s14 = sshll.u32 %s459_s13, 4  ;;  %s245_s14 = int_to_ptr.vmem [resolvable:$true] %s244_s14 }
  0x11   :  { %224 = vmatpush.bf16.msra.mxu1 %v339_v2  ;;  %v337_v5 = vld [vmem:[#allocation7 + $0x28] sm:$0xff]  ;;  %v328_v6 = vld [vmem:[#allocation5 + $0x20] sm:$0xff]  ;;  %v327_v8 = vld [vmem:[#allocation5 + $0x18] sm:$0xff] }
  0x12   :  { %v336_v7 = vld [vmem:[#allocation7 + $0x20] sm:$0xff]  ;;  %v326_v9 = vld [vmem:[#allocation5 + $0x10] sm:$0xff]  ;;  %v325_v10 = vld [vmem:[#allocation5 + $0x8] sm:$0xff] }
  0x13   :  { %v324_v11 = vld [vmem:[#allocation5] sm:$0xff]  ;;  %v68_v12 = vld [vmem:[#allocation2] sm:$0xff]  ;;  %v69_v13 = vld [vmem:[#allocation2 + $0x8] sm:$0xff] }
  0x14   :  { %140 = vmatpush.bf16.msra.mxu0 %v330_v1  ;;  %v70_v14 = vpack.c.bf16 %v69_v13, %v68_v12  ;;  %v335_v15 = vld [vmem:[#allocation7 + $0x18] sm:$0xff]  ;;  %v334_v16 = vld [vmem:[#allocation7 + $0x10] sm:$0xff]  ;;  %v333_v17 = vld [vmem:[#allocation7 + $0x8] sm:$0xff] }
  0x15   :  { %225 = vmatpush.bf16.msra.mxu1 %v338_v3  ;;  %v332_v18 = vld [vmem:[#allocation7] sm:$0xff]  ;;  %v348_v20 = vld [vmem:[%s516_s2] ss:$0 sm:$0xff]  ;;  %s246_s2 = sshll.u32 %s519_s5, 4  ;;  %s247_s2 = int_to_ptr.hbm [resolvable:$true] %s246_s2 }
  0x16   :  { %v349_v27 = vld [vmem:[%s518_s4] ss:$0 sm:$0xff] }
  0x18   :  { %141 = vmatpush.bf16.msra.mxu0 %v329_v4 }
  0x19   :  { %226 = vmatpush.bf16.msra.mxu1 %v337_v5 }
  0x1c   :  { %142 = vmatpush.bf16.msra.mxu0 %v328_v6 }
  0x1d   :  { %227 = vmatpush.bf16.msra.mxu1 %v336_v7 }
  0x20   :  { %143 = vmatpush.bf16.msra.mxu0 %v327_v8 }
  0x21   :  { %228 = vmatpush.bf16.msra.mxu1 %v335_v15 }
  0x24   :  { %144 = vmatpush.bf16.msra.mxu0 %v326_v9 }
  0x25   :  { %229 = vmatpush.bf16.msra.mxu1 %v334_v16 }
  0x28   :  { %145 = vmatpush.bf16.msra.mxu0 %v325_v10 }
  0x29   :  { %230 = vmatpush.bf16.msra.mxu1 %v333_v17 }
  0x2c   :  { %146 = vmatpush.bf16.msra.mxu0 %v324_v11 }
  0x2d   :  { %231 = vmatpush.bf16.msra.mxu1 %v332_v18 }
  0x2f   :  { %147 = vmatmul.bf16.vlgmr.msra.gmra.mxu0 %v70_v14 }
  0xac   :  { %v148_v19 = vpop.f32.mrf.mxu0 }
  0xad   :  { %v149_v21 = vadd.f32 %v348_v20, %v148_v19 }
  0xaf   :  { %v153_v24 = vmax.f32 %v149_v21, 0.0 }
  0xb4   :  { %v150_v22 = vpop.f32.mrf.mxu0 }
  0xb5   :  { %v151_v23 = vadd.f32 %v348_v20, %v150_v22 }
  0xb7   :  { %v154_v25 = vmax.f32 %v151_v23, 0.0 }
  0xb9   :  { %v155_v26 = vpack.c.bf16 %v154_v25, %v153_v24 }
  0xbb   :  { %232 = vmatmul.bf16.vlgmr.msra.gmra.mxu1 %v155_v26 }
 0x138   :  { %v233_v28 = vpop.f32.mrf.mxu1 }
 0x139   :  { %v234_v29 = vadd.f32 %v349_v27, %v233_v28 }
 0x13b   :  { %238 = vst [vmem:[#allocation8] sm:$0xff] %v234_v29 }
 0x140   :  { %v235_v30 = vpop.f32.mrf.mxu1 }
 0x141   :  { %v236_v31 = vadd.f32 %v349_v27, %v235_v30 }
 0x143   :  { %239 = vst [vmem:[#allocation8 + $0x8] sm:$0xff] %v236_v31 }
 0x144   :  { %252 = dma.vmem_to_hbm [thread:$0]  %s245_s14, 256, %s247_s2, [#allocation4], %s456_s30, %s456_s30, %s457_s6  }
 0x145   :  { %450 = dma.done.wait [#allocation4], 256  }
 0x146   :  { %451 = vsyncadd [#allocation4], 4294967040 }
 0x147   :  { %257 = vsyncpa [#allocation3], 1 }
 0x148   :  { %258 = vsyncpa [#allocation6], 1 }
 0x149   :  { %259 = vsyncpa [#allocation4], 1 }

</bundles_post_ra>
